<compile_context>
chip_gen: v7x
topology: tpu7x:2x2x1
jax: 0.10.0
libtpu: 0.0.40
codegen_flags: <defaults>
</compile_context>

<pallas_src>
import jax
import jax.numpy as jnp
from jax.experimental import pallas as pl
from jax.experimental.pallas import tpu as pltpu

BN_EPS = 1e-5
LANE = 128
SUBLANE = 8
TB_TARGET = 1024  # batch-tile target; sweep 512-2048 per the perf review


def _round_up(x, m):
    return ((x + m - 1) // m) * m


def _has_bf16_vpu():
    """bf16 VPU/EUP datapath exists on v6e and later; keep f32 on v5e/older."""
    try:
        kind = jax.devices()[0].device_kind.lower()
    except Exception:
        return False
    return any(tag in kind for tag in ("v6", "v7", "7x"))


def _make_news_encoder_kernel(num_linear_layers: int):
    """After the BN fold, every layer (hidden + output) is dot + bias + ReLU."""

    def kernel(*refs):
        # ref order: x, [w_i (bf16), b_i (epilogue dtype)] x layers, out
        x_ref = refs[0]
        out_ref = refs[-1]

        h = x_ref[...]  # [TB, d_in] bf16
        idx = 1
        for _ in range(num_linear_layers):
            w_ref, b_ref = refs[idx], refs[idx + 1]
            idx += 2
            # bf16 operands into the MXU, f32 accumulation.
            acc = jnp.dot(
                h.astype(jnp.bfloat16), w_ref[...],
                preferred_element_type=jnp.float32,
            )
            b = b_ref[...]
            # bias + ReLU epilogue in the bias dtype (f32 on v5e, bf16 on v6e+).
            h = jnp.maximum(acc.astype(b.dtype) + b, 0.0)

        out_ref[...] = h.astype(out_ref.dtype)

    return kernel


def prepare_news_encoder_params(params, *, epilogue_dtype=None):
    """One-time host prep (call at weight-load time, NOT per forward call).

    Folds eval-mode BatchNorm into the following Linear (ReLU sits before BN,
    so BN folds forward), pads hidden/output feature dims to multiples of 128,
    casts weights to bf16 (MXU operands) and biases to the epilogue dtype.

    Returns a dict {"ws": [...], "bs": [...], "d_in": int, "d_out": int}.
    """
    if epilogue_dtype is None:
        epilogue_dtype = jnp.bfloat16 if _has_bf16_vpu() else jnp.float32

    ws, bs = [], []
    pend_scale = None  # [1, d] BN scale pending to fold into the next linear
    pend_shift = None  # [1, d] BN shift pending to fold into the next linear

    for lp in params["layers"]:
        w = lp["w"].astype(jnp.float32)  # [in, out]
        b = lp["b"].astype(jnp.float32)  # [1, out]
        if pend_scale is not None:
            b = b + pend_shift @ w
            w = pend_scale.reshape(-1, 1) * w
        ws.append(w)
        bs.append(b)
        # y = (h - mean) * rsqrt(var+eps) * gamma + beta = h*scale + shift
        scale = lp["gamma"] * jax.lax.rsqrt(lp["var"] + BN_EPS)
        shift = lp["beta"] - lp["mean"] * scale
        pend_scale, pend_shift = scale, shift

    w_out = params["w_out"].astype(jnp.float32)
    b_out = params["b_out"].astype(jnp.float32)
    if pend_scale is not None:
        b_out = b_out + pend_shift @ w_out
        w_out = pend_scale.reshape(-1, 1) * w_out
    ws.append(w_out)
    bs.append(b_out)

    # Pad output dims (and input dims of every layer after the first) to 128 so
    # vregs/MXU lanes are full and output stores are lane-dense/unmasked.  The
    # FIRST layer's input dim is left at the true d_in, so x needs no host-side
    # feature padding.  Padded weight rows/cols and bias lanes are exactly
    # zero, and ReLU keeps padded lanes exactly zero through every layer.
    ws_p, bs_p = [], []
    for li, (w, b) in enumerate(zip(ws, bs)):
        di, do = w.shape
        di_p = di if li == 0 else _round_up(di, LANE)
        do_p = _round_up(do, LANE)
        w_p = jnp.zeros((di_p, do_p), jnp.float32).at[:di, :do].set(w)
        b_p = jnp.zeros((1, do_p), jnp.float32).at[:, :do].set(b)
        ws_p.append(w_p.astype(jnp.bfloat16))    # MXU operands in bf16
        bs_p.append(b_p.astype(epilogue_dtype))  # epilogue dtype (f32 on v5e)

    if params["layers"]:
        d_in = int(params["layers"][0]["w"].shape[0])
    else:
        d_in = int(params["w_out"].shape[0])
    return {
        "ws": ws_p,
        "bs": bs_p,
        "d_in": d_in,
        "d_out": int(params["w_out"].shape[1]),
    }


def news_encoder_forward(x, prepared, *, tb=None, out_dtype=jnp.float32,
                         return_padded=False):
    """Runs the NewsEncoder forward pass as one Pallas call.

    Args:
      x:        [B, title_size] float (cast to bf16 internally).
      prepared: output of prepare_news_encoder_params (folded/padded params).
      tb:       optional batch tile; default targets 1024 rows and keeps the
                grid >= 2 steps when the batch allows (v7x dual TensorCores).
      out_dtype: output dtype (f32 default; bf16 halves output HBM traffic).
      return_padded: if True, return the [b_pad, 128-padded] result directly
                (skips an extra HBM read+write for the slice).
    Returns:
      [B, head_num * head_dim] (or the padded block if return_padded).
    """
    ws, bs = prepared["ws"], prepared["bs"]
    B, d_in = x.shape
    assert d_in == ws[0].shape[0], (d_in, ws[0].shape)
    d_out = prepared["d_out"]
    d_out_pad = ws[-1].shape[1]

    # Batch tile selection.
    if tb is None:
        if B >= 2 * TB_TARGET:
            tb = TB_TARGET
        elif B > 2 * SUBLANE:
            # Split into >= 2 grid steps so v7x's two TensorCores both get work.
            tb = min(_round_up(pl.cdiv(B, 2), SUBLANE), TB_TARGET)
        else:
            tb = _round_up(max(B, 1), SUBLANE)
    b_pad = _round_up(B, tb)

    # bf16 input, true feature width (no host-side feature padding / no extra
    # HBM pass).  Batch padding only when B is not a multiple of tb; padded
    # rows never feed real rows and are dropped at the end.
    x_in = x.astype(jnp.bfloat16)
    if b_pad != B:
        x_in = jnp.zeros((b_pad, d_in), jnp.bfloat16).at[:B].set(x_in)

    flat_inputs = [x_in]
    in_specs = [pl.BlockSpec((tb, d_in), lambda i: (i, 0))]
    for w, b in zip(ws, bs):
        flat_inputs.extend([w, b])
        # Grid-invariant params: constant index_map, single buffer.
        in_specs.append(pl.BlockSpec(w.shape, lambda i: (0, 0),
                                     pipeline_mode=pl.Buffered(1)))
        in_specs.append(pl.BlockSpec(b.shape, lambda i: (0, 0),
                                     pipeline_mode=pl.Buffered(1)))
    out_spec = pl.BlockSpec((tb, d_out_pad), lambda i: (i, 0))

    out_bytes = jnp.dtype(out_dtype).itemsize
    flops = 2 * b_pad * sum(w.shape[0] * w.shape[1] for w in ws)
    bytes_accessed = (
        x_in.size * 2
        + sum(w.size * 2 for w in ws)
        + sum(b.size * b.dtype.itemsize for b in bs)
        + b_pad * d_out_pad * out_bytes
    )

    # VMEM budget: double-buffered x/out tiles + single-buffered weights/biases
    # + headroom for f32 intermediates.  Only set an explicit limit when a big
    # tile would exceed the default scoped VMEM (relevant when sweeping tb,
    # especially on v7x: 64 MiB physical / 32 MiB default scoped).
    max_width = max(max(w.shape[1] for w in ws), d_in)
    vmem_est = (
        2 * tb * d_in * 2
        + 2 * tb * d_out_pad * out_bytes
        + sum(w.size * 2 for w in ws)
        + sum(b.size * b.dtype.itemsize for b in bs)
        + 4 * tb * max_width * 4
    )
    cp_kwargs = dict(dimension_semantics=("parallel",))
    if vmem_est > 24 * 1024 * 1024:
        cp_kwargs["vmem_limit_bytes"] = int(
            min(vmem_est * 5 // 4, 100 * 1024 * 1024))

    out_padded = pl.pallas_call(
        _make_news_encoder_kernel(len(ws)),
        out_shape=jax.ShapeDtypeStruct((b_pad, d_out_pad), out_dtype),
        grid=(b_pad // tb,),
        in_specs=in_specs,
        out_specs=out_spec,
        compiler_params=pltpu.CompilerParams(**cp_kwargs),
        cost_estimate=pl.CostEstimate(
            flops=flops, transcendentals=0, bytes_accessed=bytes_accessed),
    )(*flat_inputs)

    if return_padded:
        # Consumers reshaping to (B, head_num, head_dim) can ignore the zero
        # tail / padded rows and save one full HBM pass over the output.
        return out_padded
    return out_padded[:B, :d_out]


def init_params(key, title_size, units_per_layer, head_num, head_dim):
    """Deterministic parameter init mirroring the PyTorch module's shapes."""
    params = {"layers": []}
    in_dim = title_size
    for units in units_per_layer:
        key, kw, kb, kg, kbe, km, kv = jax.random.split(key, 7)
        bound = 1.0 / jnp.sqrt(in_dim)
        # Stored pre-transposed: [in, out] (PyTorch Linear weight is [out, in]).
        w = jax.random.uniform(kw, (in_dim, units), jnp.float32, -bound, bound)
        b = jax.random.uniform(kb, (1, units), jnp.float32, -bound, bound)
        gamma = 1.0 + 0.1 * jax.random.normal(kg, (1, units), jnp.float32)
        beta = 0.1 * jax.random.normal(kbe, (1, units), jnp.float32)
        mean = 0.1 * jax.random.normal(km, (1, units), jnp.float32)
        var = 1.0 + 0.1 * jax.random.uniform(kv, (1, units), jnp.float32)
        params["layers"].append(
            dict(w=w, b=b, gamma=gamma, beta=beta, mean=mean, var=var)
        )
        in_dim = units

    out_dim = head_num * head_dim
    key, kw, kb = jax.random.split(key, 3)
    bound = 1.0 / jnp.sqrt(in_dim)
    params["w_out"] = jax.random.uniform(
        kw, (in_dim, out_dim), jnp.float32, -bound, bound
    )
    params["b_out"] = jax.random.uniform(
        kb, (1, out_dim), jnp.float32, -bound, bound
    )
    return params


def reference_forward(x, params):
    """Plain-JAX f32 reference (original eval-mode semantics, no fold)."""
    h = x
    for lp in params["layers"]:
        h = jnp.maximum(h @ lp["w"] + lp["b"], 0.0)
        h = (h - lp["mean"]) * jax.lax.rsqrt(lp["var"] + BN_EPS) * lp["gamma"] \
            + lp["beta"]
    return jnp.maximum(h @ params["w_out"] + params["b_out"], 0.0)


if __name__ == "__main__":
    # Small hparams consistent with the module:
    #   title_size (document vector dim) = 32
    #   newsencoder_units_per_layer      = [64, 64]
    #   head_num = 4, head_dim = 16  -> OUTPUT_DIM = 64
    TITLE_SIZE = 32
    UNITS_PER_LAYER = (64, 64)
    HEAD_NUM, HEAD_DIM = 4, 16
    BATCH = 8

    key = jax.random.PRNGKey(0)
    key, kx = jax.random.split(key)
    x = jax.random.normal(kx, (BATCH, TITLE_SIZE), jnp.float32)
    params = init_params(key, TITLE_SIZE, UNITS_PER_LAYER, HEAD_NUM, HEAD_DIM)

    # One-time prep (BN fold, pad, bf16 cast) -- done at weight-load time.
    prepared = prepare_news_encoder_params(params)

    out = news_encoder_forward(x, prepared)
    out = jax.block_until_ready(out)

    ref = reference_forward(x, params)
    assert out.shape == (BATCH, HEAD_NUM * HEAD_DIM), out.shape
    # Tolerance relaxed vs pure-f32: MXU operands (x and weights) are bf16 and
    # the epilogue may be bf16 on v6e/v7x.
    assert jnp.allclose(out, ref, atol=5e-2, rtol=5e-2), float(
        jnp.max(jnp.abs(out - ref))
    )

    print("KERNEL_OK")
</pallas_src>

<mosaic_0001>
module attributes {stable_mosaic.version = 11 : i64} {
  func.func @kernel(%arg0: i32, %arg1: memref<8x32xbf16, #tpu.memory_space<vmem>>, %arg2: memref<32x128xbf16, #tpu.memory_space<vmem>>, %arg3: memref<1x128xf32, #tpu.memory_space<vmem>>, %arg4: memref<128x128xbf16, #tpu.memory_space<vmem>>, %arg5: memref<1x128xf32, #tpu.memory_space<vmem>>, %arg6: memref<128x128xbf16, #tpu.memory_space<vmem>>, %arg7: memref<1x128xf32, #tpu.memory_space<vmem>>, %arg8: memref<8x128xf32, #tpu.memory_space<vmem>>) attributes {dimension_semantics = [#tpu.dimension_semantics<parallel>], iteration_bounds = array<i64: 1>, scalar_prefetch = 0 : i64, scratch_operands = 0 : i64, tpu.core_type = #tpu.core_type<tc>, window_params = [{transform_indices = @transform_0, window_bounds = array<i64: 8, 32>}, {pipeline_mode = #tpu.pipeline_mode<synchronous>, transform_indices = @transform_1, window_bounds = array<i64: 32, 128>}, {pipeline_mode = #tpu.pipeline_mode<synchronous>, transform_indices = @transform_2, window_bounds = array<i64: 1, 128>}, {pipeline_mode = #tpu.pipeline_mode<synchronous>, transform_indices = @transform_3, window_bounds = array<i64: 128, 128>}, {pipeline_mode = #tpu.pipeline_mode<synchronous>, transform_indices = @transform_4, window_bounds = array<i64: 1, 128>}, {pipeline_mode = #tpu.pipeline_mode<synchronous>, transform_indices = @transform_5, window_bounds = array<i64: 128, 128>}, {pipeline_mode = #tpu.pipeline_mode<synchronous>, transform_indices = @transform_6, window_bounds = array<i64: 1, 128>}, {transform_indices = @transform_7, window_bounds = array<i64: 8, 128>}]} {
    %c0 = arith.constant 0 : index
    %c0_0 = arith.constant 0 : index
    %0 = vector.load %arg1[%c0, %c0_0] : memref<8x32xbf16, #tpu.memory_space<vmem>>, vector<8x32xbf16>
    %c0_1 = arith.constant 0 : index
    %c0_2 = arith.constant 0 : index
    %1 = vector.load %arg2[%c0_1, %c0_2] : memref<32x128xbf16, #tpu.memory_space<vmem>>, vector<32x128xbf16>
    %cst = arith.constant dense<0.000000e+00> : vector<8x128xf32>
    %2 = tpu.matmul %0, %1, %cst {dimension_numbers = #tpu.dot_dimension_numbers<[1], [0], [0], [1], [0, 0, 1, 1], [], []>} : vector<8x32xbf16>, vector<32x128xbf16>, vector<8x128xf32> -> vector<8x128xf32>
    %c0_3 = arith.constant 0 : index
    %c0_4 = arith.constant 0 : index
    %3 = vector.load %arg3[%c0_3, %c0_4] : memref<1x128xf32, #tpu.memory_space<vmem>>, vector<1x128xf32>
    %4 = vector.broadcast %3 : vector<1x128xf32> to vector<8x128xf32>
    %5 = arith.addf %2, %4 : vector<8x128xf32>
    %cst_5 = arith.constant 0.000000e+00 : f32
    %6 = vector.broadcast %cst_5 : f32 to vector<8x128xf32>
    %7 = arith.maximumf %5, %6 : vector<8x128xf32>
    %8 = arith.truncf %7 : vector<8x128xf32> to vector<8x128xbf16>
    %c0_6 = arith.constant 0 : index
    %c0_7 = arith.constant 0 : index
    %9 = vector.load %arg4[%c0_6, %c0_7] : memref<128x128xbf16, #tpu.memory_space<vmem>>, vector<128x128xbf16>
    %cst_8 = arith.constant dense<0.000000e+00> : vector<8x128xf32>
    %10 = tpu.matmul %8, %9, %cst_8 {dimension_numbers = #tpu.dot_dimension_numbers<[1], [0], [0], [1], [0, 0, 1, 1], [], []>} : vector<8x128xbf16>, vector<128x128xbf16>, vector<8x128xf32> -> vector<8x128xf32>
    %c0_9 = arith.constant 0 : index
    %c0_10 = arith.constant 0 : index
    %11 = vector.load %arg5[%c0_9, %c0_10] : memref<1x128xf32, #tpu.memory_space<vmem>>, vector<1x128xf32>
    %12 = vector.broadcast %11 : vector<1x128xf32> to vector<8x128xf32>
    %13 = arith.addf %10, %12 : vector<8x128xf32>
    %cst_11 = arith.constant 0.000000e+00 : f32
    %14 = vector.broadcast %cst_11 : f32 to vector<8x128xf32>
    %15 = arith.maximumf %13, %14 : vector<8x128xf32>
    %16 = arith.truncf %15 : vector<8x128xf32> to vector<8x128xbf16>
    %c0_12 = arith.constant 0 : index
    %c0_13 = arith.constant 0 : index
    %17 = vector.load %arg6[%c0_12, %c0_13] : memref<128x128xbf16, #tpu.memory_space<vmem>>, vector<128x128xbf16>
    %cst_14 = arith.constant dense<0.000000e+00> : vector<8x128xf32>
    %18 = tpu.matmul %16, %17, %cst_14 {dimension_numbers = #tpu.dot_dimension_numbers<[1], [0], [0], [1], [0, 0, 1, 1], [], []>} : vector<8x128xbf16>, vector<128x128xbf16>, vector<8x128xf32> -> vector<8x128xf32>
    %c0_15 = arith.constant 0 : index
    %c0_16 = arith.constant 0 : index
    %19 = vector.load %arg7[%c0_15, %c0_16] : memref<1x128xf32, #tpu.memory_space<vmem>>, vector<1x128xf32>
    %20 = vector.broadcast %19 : vector<1x128xf32> to vector<8x128xf32>
    %21 = arith.addf %18, %20 : vector<8x128xf32>
    %cst_17 = arith.constant 0.000000e+00 : f32
    %22 = vector.broadcast %cst_17 : f32 to vector<8x128xf32>
    %23 = arith.maximumf %21, %22 : vector<8x128xf32>
    %c0_18 = arith.constant 0 : index
    %c0_19 = arith.constant 0 : index
    %24 = vector.load %arg8[%c0_18, %c0_19] : memref<8x128xf32, #tpu.memory_space<vmem>>, vector<8x128xf32>
    tpu.vector_store %arg8[%c0_18, %c0_19], %23 {strides = array<i32>} : memref<8x128xf32, #tpu.memory_space<vmem>>, vector<8x128xf32>,
    return
  }
  func.func @transform_0(%arg0: i32) -> (i32, i32) {
    %c0_i32 = arith.constant 0 : i32
    %c0_i32_0 = arith.constant 0 : i32
    return %arg0, %c0_i32 : i32, i32
  }
  func.func @transform_1(%arg0: i32) -> (i32, i32) {
    %c0_i32 = arith.constant 0 : i32
    %c0_i32_0 = arith.constant 0 : i32
    %c0_i32_1 = arith.constant 0 : i32
    return %c0_i32, %c0_i32_0 : i32, i32
  }
  func.func @transform_2(%arg0: i32) -> (i32, i32) {
    %c0_i32 = arith.constant 0 : i32
    %c0_i32_0 = arith.constant 0 : i32
    %c0_i32_1 = arith.constant 0 : i32
    return %c0_i32, %c0_i32_0 : i32, i32
  }
  func.func @transform_3(%arg0: i32) -> (i32, i32) {
    %c0_i32 = arith.constant 0 : i32
    %c0_i32_0 = arith.constant 0 : i32
    %c0_i32_1 = arith.constant 0 : i32
    return %c0_i32, %c0_i32_0 : i32, i32
  }
  func.func @transform_4(%arg0: i32) -> (i32, i32) {
    %c0_i32 = arith.constant 0 : i32
    %c0_i32_0 = arith.constant 0 : i32
    %c0_i32_1 = arith.constant 0 : i32
    return %c0_i32, %c0_i32_0 : i32, i32
  }
  func.func @transform_5(%arg0: i32) -> (i32, i32) {
    %c0_i32 = arith.constant 0 : i32
    %c0_i32_0 = arith.constant 0 : i32
    %c0_i32_1 = arith.constant 0 : i32
    return %c0_i32, %c0_i32_0 : i32, i32
  }
  func.func @transform_6(%arg0: i32) -> (i32, i32) {
    %c0_i32 = arith.constant 0 : i32
    %c0_i32_0 = arith.constant 0 : i32
    %c0_i32_1 = arith.constant 0 : i32
    return %c0_i32, %c0_i32_0 : i32, i32
  }
  func.func @transform_7(%arg0: i32) -> (i32, i32) {
    %c0_i32 = arith.constant 0 : i32
    %c0_i32_0 = arith.constant 0 : i32
    return %arg0, %c0_i32 : i32, i32
  }
}

</mosaic_0001>

<bundles_post_ra>
// kernel: tpu_custom_call.1
= control target key start
LH: loop header
LB: loop body
LE: loop exit
PB: predicated region body
PF: predicated region fallthrough
CT: control target
= control target key end

     0   :  { %12 = vsyncpa [#allocation3], 0  ;;  %s781_s0 = inlined_call_operand.hbm [shape: bf16[8,32], index: 0, kind: input, shape index: {}]   ;;  %s782_s1 = inlined_call_operand.hbm [shape: bf16[32,128], index: 1, kind: input, shape index: {}]   ;;  %s783_s2 = inlined_call_operand.vmem [shape: f32[1,128], index: 2, kind: input, shape index: {}]   ;;  %s784_s3 = inlined_call_operand.hbm [shape: bf16[128,128], index: 3, kind: input, shape index: {}]   ;;  %s785_s4 = inlined_call_operand.vmem [shape: f32[1,128], index: 4, kind: input, shape index: {}]   ;;  %s786_s5 = inlined_call_operand.hbm [shape: bf16[128,128], index: 5, kind: input, shape index: {}]   ;;  %s787_s6 = inlined_call_operand.vmem [shape: f32[1,128], index: 6, kind: input, shape index: {}]   ;;  %s788_s7 = inlined_call_operand.hbm [shape: f32[8,128], index: 7, kind: output, shape index: {}]  }
   0x1   :  { %13 = vsyncpa [#allocation6], 0 }
   0x2   :  { %14 = vsyncpa [#allocation9], 0 }
   0x3   :  { %15 = vsyncpa [#allocation4], 0  ;;  %s630_s24 = smov [#allocation5]   ;;  %s512_s28 = scalar_lea.hbm %s782_s1, 256 }
   0x4   :  { %s31_s25 = sshll.u32 %s630_s24, 4  ;;  %p513_p0 = scmp.ne.s32.totalorder %s782_s1, %s512_s28  ;;  %s32_s25 = int_to_ptr.vmem [resolvable:$true] %s31_s25 }
   0x5   :  { %p516_p1 = scmp.lt.u32.totalorder %s512_s28, %s782_s1 }
   0x7   :  { %p518_p2 = pnand %p516_p1, %p513_p0 }
   0x9   :  { %521 = shalt.err (!%p518_p2)
}
   0xa   :  { %s522_s10 = scalar_lea.vmem %s32_s25, 256  ;;  %p527_p4 = scmp.lt.s32.totalorder %s32_s25, %s32_s25 }
   0xb   :  { %p523_p3 = scmp.ne.s32.totalorder %s32_s25, %s522_s10  ;;  %p528_p5 = scmp.lt.s32.totalorder %s522_s10, %s522_s10 }
   0xd   :  { %p529_p6 = por %p528_p5, %p527_p4 }
   0xf   :  { %p530_p7 = pnand %p529_p6, %p523_p3 }
  0x11   :  { %533 = shalt.err (!%p530_p7)
}
  0x12   :  { %s631_s11 = smov 64   ;;  %s632_s12 = smov 4  }
  0x13   :  { %37 = dma.hbm_to_vmem [thread:$0]  %s782_s1, 256, %s32_s25, [#allocation6], %s631_s11, %s631_s11, %s632_s12  }
  0x14   :  { %s633_s15 = smov [#allocation2]   ;;  %s634_s17 = smov [#allocation7]  }
  0x15   :  { %s22_s16 = sshll.u32 %s633_s15, 4  ;;  %s45_s18 = sshll.u32 %s634_s17, 4  ;;  %s23_s16 = int_to_ptr.vmem [resolvable:$true] %s22_s16  ;;  %s46_s18 = int_to_ptr.vmem [resolvable:$true] %s45_s18 }
  0x16   :  { %s534_s21 = scalar_lea.hbm %s781_s0, 64 }
  0x17   :  { %p535_p8 = scmp.ne.s32.totalorder %s781_s0, %s534_s21  ;;  %p538_p9 = scmp.lt.u32.totalorder %s534_s21, %s781_s0 }
  0x19   :  { %p540_p10 = pnand %p538_p9, %p535_p8 }
  0x1b   :  { %543 = shalt.err (!%p540_p10)
}
  0x1c   :  { %s544_s1 = scalar_lea.vmem %s23_s16, 64  ;;  %p549_p12 = scmp.lt.s32.totalorder %s23_s16, %s23_s16 }
  0x1d   :  { %p545_p11 = scmp.ne.s32.totalorder %s23_s16, %s544_s1  ;;  %p550_p13 = scmp.lt.s32.totalorder %s544_s1, %s544_s1 }
  0x1f   :  { %p551_p0 = por %p550_p13, %p549_p12 }
  0x21   :  { %p552_p1 = pnand %p551_p0, %p545_p11 }
  0x23   :  { %555 = shalt.err (!%p552_p1)
}
  0x24   :  { %25 = dma.hbm_to_vmem [thread:$0]  %s781_s0, 64, %s23_s16, [#allocation3]  }
  0x25   :  { %s556_s30 = scalar_lea.hbm %s784_s3, 1024 }
  0x26   :  { %p557_p2 = scmp.ne.s32.totalorder %s784_s3, %s556_s30  ;;  %p560_p3 = scmp.lt.u32.totalorder %s556_s30, %s784_s3 }
  0x28   :  { %p562_p4 = pnand %p560_p3, %p557_p2 }
  0x2a   :  { %565 = shalt.err (!%p562_p4)
}
  0x2b   :  { %s566_s14 = scalar_lea.vmem %s46_s18, 1024  ;;  %p571_p6 = scmp.lt.s32.totalorder %s46_s18, %s46_s18 }
  0x2c   :  { %p567_p5 = scmp.ne.s32.totalorder %s46_s18, %s566_s14  ;;  %p572_p7 = scmp.lt.s32.totalorder %s566_s14, %s566_s14 }
  0x2e   :  { %p573_p8 = por %p572_p7, %p571_p6 }
  0x30   :  { %p574_p9 = pnand %p573_p8, %p567_p5 }
  0x32   :  { %577 = shalt.err (!%p574_p9)
}
  0x33   :  { %51 = dma.hbm_to_vmem [thread:$0]  %s784_s3, 1024, %s46_s18, [#allocation6], %s631_s11, %s631_s11, %s632_s12  }
  0x34   :  { %s635_s16 = smov [#allocation8]   ;;  %s578_s21 = scalar_lea.hbm %s786_s5, 1024 }
  0x35   :  { %s59_s17 = sshll.u32 %s635_s16, 4  ;;  %p579_p10 = scmp.ne.s32.totalorder %s786_s5, %s578_s21  ;;  %s60_s17 = int_to_ptr.vmem [resolvable:$true] %s59_s17 }
  0x36   :  { %p582_p11 = scmp.lt.u32.totalorder %s578_s21, %s786_s5 }
  0x38   :  { %p584_p12 = pnand %p582_p11, %p579_p10 }
  0x3a   :  { %587 = shalt.err (!%p584_p12)
}
  0x3b   :  { %s588_s1 = scalar_lea.vmem %s60_s17, 1024  ;;  %p593_p0 = scmp.lt.s32.totalorder %s60_s17, %s60_s17 }
  0x3c   :  { %p589_p13 = scmp.ne.s32.totalorder %s60_s17, %s588_s1  ;;  %p594_p1 = scmp.lt.s32.totalorder %s588_s1, %s588_s1 }
  0x3e   :  { %p595_p2 = por %p594_p1, %p593_p0 }
  0x40   :  { %p596_p3 = pnand %p595_p2, %p589_p13 }
  0x42   :  { %599 = shalt.err (!%p596_p3)
}
  0x43   :  { %65 = dma.hbm_to_vmem [thread:$0]  %s786_s5, 1024, %s60_s17, [#allocation9], %s631_s11, %s631_s11, %s632_s12  }
  0x44   :  { %622 = dma.done.wait [#allocation3], 64  }
  0x45   :  { %623 = vsyncadd [#allocation3], 4294967232 }
  0x46   :  { %624 = dma.done.wait [#allocation6], 1280  }
  0x47   :  { %625 = vsyncadd [#allocation6], 4294966016 }
  0x48   :  { %626 = dma.done.wait [#allocation9], 1024  }
  0x49   :  { %627 = vsyncadd [#allocation9], 4294966272  ;;  %v636_v0 = vmov 0.0   ;;  %vm637_vm0 = vmmov 0   ;;  %v494_v1 = vld [vmem:[#allocation5] sm:$0xff]   ;;  %v495_v2 = vld [vmem:[#allocation5 + $0x8] sm:$0xff]  }
  0x4a   :  { %437 = vmatprep.subr.bf16.mxu0 %v636_v0  ;;  %441 = vmatprep.mubr.msk.bf16.mxu0 %vm637_vm0, %v636_v0  ;;  %v496_v3 = vld [vmem:[#allocation7] sm:$0xff]   ;;  %vm105_vm1 = vcmask 261120   ;;  %v497_v4 = vld [vmem:[#allocation7 + $0x8] sm:$0xff]   ;;  %v498_v6 = vld [vmem:[#allocation7 + $0x10] sm:$0xff]   ;;  %s638_s28 = smov [#allocation10]  }
  0x4b   :  { %445 = vmatprep.subr.bf16.mxu1 %v636_v0  ;;  %461 = vmatprep.mubr.msk.bf16.mxu1 %vm637_vm0, %v636_v0  ;;  %v81_v5 = vld [vmem:[#allocation2] sm:$0xf]  ;;  %v499_v7 = vld [vmem:[#allocation7 + $0x18] sm:$0xff]   ;;  %v500_v8 = vld [vmem:[#allocation7 + $0x20] sm:$0xff]   ;;  %s383_s29 = sshll.u32 %s638_s28, 4  ;;  %s384_s29 = int_to_ptr.vmem [resolvable:$true] %s383_s29 }
  0x4c   :  { %438 = vmatpush3.bf16.msra.mxu0 %v494_v1  ;;  %446 = vmatpush3.bf16.msra.mxu1 %v496_v3  ;;  %v501_v9 = vld [vmem:[#allocation7 + $0x28] sm:$0xff]   ;;  %v502_v10 = vld [vmem:[#allocation7 + $0x30] sm:$0xff]   ;;  %v503_v11 = vld [vmem:[#allocation7 + $0x38] sm:$0xff]   ;;  %p605_p5 = scmp.lt.s32.totalorder %s384_s29, %s384_s29 }
  0x4d   :  { %439 = vmatprep.subr.bf16.mxu0 %v636_v0  ;;  %447 = vmatprep.subr.bf16.mxu1 %v636_v0  ;;  %v504_v12 = vld [vmem:[#allocation8] sm:$0xff]   ;;  %v505_v13 = vld [vmem:[#allocation8 + $0x8] sm:$0xff]   ;;  %v506_v14 = vld [vmem:[#allocation8 + $0x10] sm:$0xff]  }
  0x4e   :  { %v507_v15 = vld [vmem:[#allocation8 + $0x18] sm:$0xff]   ;;  %v508_v16 = vld [vmem:[#allocation8 + $0x20] sm:$0xff]   ;;  %v509_v17 = vld [vmem:[#allocation8 + $0x28] sm:$0xff]  }
  0x4f   :  { %v394_v18 = vld [vmem:[%s783_s2] ss:$0 sm:$0xff]  ;;  %v510_v26 = vld [vmem:[#allocation8 + $0x30] sm:$0xff]   ;;  %v511_v27 = vld [vmem:[#allocation8 + $0x38] sm:$0xff]  }
  0x50   :  { %440 = vmatpush3.bf16.msra.mxu0 %v495_v2  ;;  %448 = vmatpush3.bf16.msra.mxu1 %v497_v4  ;;  %v398_v28 = vld [vmem:[%s785_s4] ss:$0 sm:$0xff]  ;;  %s600_s4 = scalar_lea.vmem %s384_s29, 128 }
  0x51   :  { %465 = vmatprep.subr.bf16.mxu0 %v636_v0  ;;  %449 = vmatprep.subr.bf16.mxu1 %v636_v0  ;;  %v407_v36 = vld [vmem:[%s787_s6] ss:$0 sm:$0xff]  ;;  %p601_p4 = scmp.ne.s32.totalorder %s384_s29, %s600_s4  ;;  %p606_p6 = scmp.lt.s32.totalorder %s600_s4, %s600_s4 }
  0x53   :  { %442 = vmatmul.mubr.msk.bf16.vlgmr.msra.gmra.mrb[0].mxu0 %vm105_vm1, %v81_v5  ;;  %p607_p7 = por %p606_p6, %p605_p5 }
  0x54   :  { %481 = vmatprep.mubr.msk.bf16.mxu0 %vm637_vm0, %v636_v0  ;;  %450 = vmatpush3.bf16.msra.mxu1 %v498_v6 }
  0x55   :  { %451 = vmatprep.subr.bf16.mxu1 %v636_v0  ;;  %466 = vmatpush3.bf16.msra.mxu0 %v504_v12  ;;  %p608_p8 = pnand %p607_p7, %p601_p4 }
  0x56   :  { %467 = vmatprep.subr.bf16.mxu0 %v636_v0 }
  0x58   :  { %452 = vmatpush3.bf16.msra.mxu1 %v499_v7 }
  0x59   :  { %453 = vmatprep.subr.bf16.mxu1 %v636_v0  ;;  %468 = vmatpush3.bf16.msra.mxu0 %v505_v13 }
  0x5a   :  { %469 = vmatprep.subr.bf16.mxu0 %v636_v0 }
  0x5c   :  { %454 = vmatpush3.bf16.msra.mxu1 %v500_v8 }
  0x5d   :  { %455 = vmatprep.subr.bf16.mxu1 %v636_v0  ;;  %470 = vmatpush3.bf16.msra.mxu0 %v506_v14 }
  0x5e   :  { %471 = vmatprep.subr.bf16.mxu0 %v636_v0 }
  0x60   :  { %456 = vmatpush3.bf16.msra.mxu1 %v501_v9 }
  0x61   :  { %457 = vmatprep.subr.bf16.mxu1 %v636_v0  ;;  %472 = vmatpush3.bf16.msra.mxu0 %v507_v15 }
  0x62   :  { %473 = vmatprep.subr.bf16.mxu0 %v636_v0 }
  0x64   :  { %458 = vmatpush3.bf16.msra.mxu1 %v502_v10 }
  0x65   :  { %459 = vmatprep.subr.bf16.mxu1 %v636_v0  ;;  %474 = vmatpush3.bf16.msra.mxu0 %v508_v16 }
  0x66   :  { %475 = vmatprep.subr.bf16.mxu0 %v636_v0 }
  0x68   :  { %460 = vmatpush3.bf16.msra.mxu1 %v503_v11 }
  0x69   :  { %476 = vmatpush3.bf16.msra.mxu0 %v509_v17 }
  0x6a   :  { %477 = vmatprep.subr.bf16.mxu0 %v636_v0 }
  0x6d   :  { %478 = vmatpush3.bf16.msra.mxu0 %v510_v26 }
  0x6e   :  { %479 = vmatprep.subr.bf16.mxu0 %v636_v0 }
  0x71   :  { %480 = vmatpush3.bf16.msra.mxu0 %v511_v27 }
 0x126   :  { %v143_v19 = vpop.f32.mrb[0].mxu0 }
 0x127   :  { %v144_v20 = vadd.f32 %v394_v18, %v143_v19  ;;  %v443_v21 = vpop.f32.mrb[1].mxu0 }
 0x128   :  { %v146_v22 = vpop.f32.mrb[2].mxu0 }
 0x129   :  { %v149_v23 = vmax.f32 %v144_v20, 0.0  ;;  %v444_v24 = vpop.f32.mrb[3].mxu0 }
 0x12b   :  { %v150_v25 = vpack.c.bf16 %v149_v23, %v149_v23 }
 0x12d   :  { %462 = vmatmul.mubr.bf16.vlgmr.msra.gmra.mrb[0].mxu1 %v150_v25 }
 0x200   :  { %v256_v29 = vpop.f32.mrb[0].mxu1 }
 0x201   :  { %v257_v30 = vadd.f32 %v398_v28, %v256_v29  ;;  %v463_v31 = vpop.f32.mrb[1].mxu1 }
 0x202   :  { %v259_v32 = vpop.f32.mrb[2].mxu1 }
 0x203   :  { %v262_v33 = vmax.f32 %v257_v30, 0.0  ;;  %v464_v34 = vpop.f32.mrb[3].mxu1 }
 0x205   :  { %v263_v35 = vpack.c.bf16 %v262_v33, %v262_v33 }
 0x207   :  { %482 = vmatmul.mubr.bf16.vlgmr.msra.gmra.mrb[4].mxu0 %v263_v35 }
 0x2da   :  { %v369_v37 = vpop.f32.mrb[4].mxu0 }
 0x2db   :  { %v370_v38 = vadd.f32 %v407_v36, %v369_v37  ;;  %v483_v39 = vpop.f32.mrb[5].mxu0 }
 0x2dc   :  { %v372_v40 = vpop.f32.mrb[6].mxu0 }
 0x2dd   :  { %v375_v41 = vmax.f32 %v370_v38, 0.0  ;;  %v484_v42 = vpop.f32.mrb[7].mxu0 }
 0x2df   :  { %376 = vst [vmem:[#allocation10] sm:$0xff] %v375_v41 }
 0x2e0   :  { %611 = shalt.err (!%p608_p8)
}
 0x2e1   :  { %s612_s6 = scalar_lea.hbm %s788_s7, 128 }
 0x2e2   :  { %p613_p9 = scmp.ne.s32.totalorder %s788_s7, %s612_s6  ;;  %p616_p10 = scmp.lt.u32.totalorder %s612_s6, %s788_s7 }
 0x2e4   :  { %p618_p11 = pnand %p616_p10, %p613_p9 }
 0x2e6   :  { %621 = shalt.err (!%p618_p11)
}
 0x2e7   :  { %386 = dma.vmem_to_hbm [thread:$0]  %s384_s29, 128, %s788_s7, [#allocation4]  }
 0x2e8   :  { %628 = dma.done.wait [#allocation4], 128  }
 0x2e9   :  { %629 = vsyncadd [#allocation4], 4294967168 }
 0x2ea   :  { %390 = vsyncpa [#allocation3], 1 }
 0x2eb   :  { %391 = vsyncpa [#allocation6], 1 }
 0x2ec   :  { %392 = vsyncpa [#allocation9], 1 }
 0x2ed   :  { %393 = vsyncpa [#allocation4], 1 }

</bundles_post_ra>
